<compile_context>
chip_gen: v7x
topology: tpu7x:2x2x1
jax: 0.10.0
libtpu: 0.0.40
codegen_flags: <defaults>
</compile_context>

<pallas_src>
import jax
import jax.numpy as jnp
from jax.experimental import pallas as pl
from jax.experimental.pallas import tpu as pltpu


_MIN_BLOCK_BYTES = 1 << 20   # >=1 MiB blocks reach ~85%+ of the HBM roofline
_LANE = 128                  # lane (last-dim) granularity
_SUBLANE = 8                 # sublane (second-to-last dim) granularity


def _cdiv(a: int, b: int) -> int:
    return -(-a // b)


def _tpu_policy():
    """Return (split_batch, vmem_limit_bytes, vmem_budget_bytes, target_block_bytes)."""
    kind = ""
    try:
        kind = jax.devices()[0].device_kind.lower()
    except Exception:  # defensive: never fail tile selection on introspection
        pass
    if "v7" in kind:
        # v7x: 2 TensorCores per chip, only 64 MiB physical VMEM per core.
        # Keep total pipeline VMEM modest and make sure the 'parallel' batch
        # axis can be split across both cores.
        return True, 32 << 20, 24 << 20, 2 << 20
    # v5e / v6e: single TensorCore, 128 MiB physical VMEM.  v5e's default
    # scoped VMEM limit is only 16 MiB, so raise it explicitly; prefer fewer,
    # larger blocks (amortizes the ~0.35us per-step pipeline overhead).
    return False, 64 << 20, 48 << 20, 8 << 20


def _choose_tiles(bsz, ph, itemsize, *, vmem_budget, target_block, split_batch):
    """Pick (tb, tl): batch rows and flattened-lane columns per output block.

    Pipeline VMEM = 2 x (1, tl) input blocks + 2 x (tb, tl) output blocks
    (everything double-buffered); keep that under `vmem_budget`.  tb is kept
    >= 8 (or == bsz) so the per-block (1, tl) table re-read stays <= 1/tb of
    the write traffic, and block dims obey the (8, 128) divisibility rule
    (multiple of 8/128, or equal to the full array dim).
    """
    row_bytes = ph * itemsize

    def pipe_bytes(tb_, tl_):
        # 2x double-buffered input block + 2x double-buffered output block.
        return 2 * (tb_ + 1) * tl_ * itemsize

    def legal_tb(tb_):
        # Second-to-last block dim: multiple of 8, or equal to the full dim.
        if tb_ >= bsz:
            return bsz
        return max(_SUBLANE, (tb_ // _SUBLANE) * _SUBLANE)

    # ---- batch tile --------------------------------------------------------
    if row_bytes >= _MIN_BLOCK_BYTES:
        # Large rows: lane tiling below bounds VMEM; 8-16 batch rows already
        # amortise the table re-read while keeping the lane tile (DMA) big.
        tb = legal_tb(min(bsz, 16))
    else:
        # Small rows: grow tb until output blocks reach ~target_block bytes,
        # bounded by the (full-row) VMEM budget.  Both caps are >= 8 here
        # (row_bytes < 1 MiB), so legal_tb never rounds *up* past the budget.
        cap_vmem = max(1, vmem_budget // (2 * row_bytes) - 1)
        cap_tgt = max(1, _cdiv(target_block, row_bytes))
        tb = legal_tb(min(bsz, cap_vmem, cap_tgt))

    if split_batch and bsz >= 2 and _cdiv(bsz, tb) < 2:
        # v7x megacore: give the 'parallel' batch axis >= 2 grid steps
        # whenever per-step blocks stay >= _MIN_BLOCK_BYTES and the block dim
        # stays legal (multiple of 8, strictly smaller than bsz).
        half = _cdiv(bsz, 2)
        if half * row_bytes >= _MIN_BLOCK_BYTES:
            cand = legal_tb(half)
            if cand < bsz:
                tb = min(tb, cand)

    # ---- lane tile ---------------------------------------------------------
    if pipe_bytes(tb, ph) <= vmem_budget:
        tl = ph                                    # whole row fits: no tiling
    else:
        # Shrink the lane tile (never inflate tb) to fit the budget; if even a
        # single 128-lane column does not fit, shed batch rows first.
        tl_cap = vmem_budget // (2 * (tb + 1) * itemsize)
        while tl_cap < _LANE and tb > _SUBLANE:
            tb = legal_tb(tb - _SUBLANE)
            tl_cap = vmem_budget // (2 * (tb + 1) * itemsize)
        tl = min(ph, max(_LANE, (tl_cap // _LANE) * _LANE))

    return tb, tl


def _prefix_broadcast_kernel(w_ref, o_ref):
    # w_ref: (1, tl)  slice of the flattened prefix table (lane tile l).
    # o_ref: (tb, tl) output block covering tb batch rows of that lane slice.
    o_ref[...] = jnp.broadcast_to(w_ref[...], o_ref.shape)


def prefix_encoder_forward(
    prefix_weight: jax.Array,
    bsz: int,
    *,
    vmem_budget_bytes: int | None = None,
    target_block_bytes: int | None = None,
    split_batch: bool | None = None,
) -> jax.Array:
    """Pallas equivalent of PrefixEncoder.forward(bsz).

    prefix_weight: (P, H) float32 embedding table.
    Returns (bsz, P, H) float32 (the table broadcast over the batch).
    The keyword overrides exist so tests can force the tiled code paths.
    """
    P, H = prefix_weight.shape
    ph = P * H
    itemsize = jnp.dtype(prefix_weight.dtype).itemsize

    pol_split, vmem_limit, pol_budget, pol_target = _tpu_policy()
    if vmem_budget_bytes is None:
        vmem_budget_bytes = pol_budget
    if target_block_bytes is None:
        target_block_bytes = pol_target
    if split_batch is None:
        split_batch = pol_split

    tb, tl = _choose_tiles(
        bsz, ph, itemsize,
        vmem_budget=vmem_budget_bytes,
        target_block=target_block_bytes,
        split_batch=split_batch,
    )
    grid = (_cdiv(bsz, tb), _cdiv(ph, tl))

    # Lane-dense presentation: (1, P*H) table, (bsz, P*H) output slab.
    w_flat = prefix_weight.reshape(1, ph)

    out_flat = pl.pallas_call(
        _prefix_broadcast_kernel,
        out_shape=jax.ShapeDtypeStruct((bsz, ph), prefix_weight.dtype),
        grid_spec=pltpu.PrefetchScalarGridSpec(
            num_scalar_prefetch=0,
            grid=grid,
            in_specs=[
                # Same table slice for every batch step; varies with lane step.
                pl.BlockSpec((1, tl), lambda b, l: (0, l)),
            ],
            out_specs=pl.BlockSpec((tb, tl), lambda b, l: (b, l)),
        ),
        compiler_params=pltpu.CompilerParams(
            # Every (b, l) step writes a distinct output block with no carried
            # state -> both axes are megacore-shardable.
            dimension_semantics=("parallel", "parallel"),
            vmem_limit_bytes=vmem_limit,
        ),
        cost_estimate=pl.CostEstimate(
            flops=0,
            transcendentals=0,
            # writes + per-batch-step table re-reads
            bytes_accessed=(bsz * ph + grid[0] * ph) * itemsize,
        ),
    )(w_flat)

    return out_flat.reshape(bsz, P, H)


if __name__ == "__main__":
    # Module config (small, consistent with the forward semantics).
    num_prefix_tokens = 8
    hidden_size = 32
    bsz = 2

    # Deterministic init mirroring nn.init.normal_(std=0.02).
    key = jax.random.PRNGKey(0)
    prefix_weight = 0.02 * jax.random.normal(
        key, (num_prefix_tokens, hidden_size), dtype=jnp.float32
    )

    out = jax.block_until_ready(prefix_encoder_forward(prefix_weight, bsz))
    ref = jnp.broadcast_to(
        prefix_weight[None], (bsz, num_prefix_tokens, hidden_size)
    )
    assert out.shape == (bsz, num_prefix_tokens, hidden_size)
    assert out.dtype == jnp.float32
    assert jnp.array_equal(out, ref)

    # Second (still small) case with a forced tiny VMEM budget so the 2-D
    # (batch, lane) tiling, partial edge blocks, and (8, 128) block-dim rules
    # are actually exercised — the default policy never tiles at toy sizes.
    P2, H2, B2 = 16, 64, 20
    w2 = 0.02 * jax.random.normal(
        jax.random.PRNGKey(1), (P2, H2), dtype=jnp.float32
    )
    out2 = jax.block_until_ready(
        prefix_encoder_forward(
            w2,
            B2,
            vmem_budget_bytes=64 * 1024,   # forces tb=8, tl=896 -> grid (3, 2)
            target_block_bytes=16 * 1024,
            split_batch=True,
        )
    )
    ref2 = jnp.broadcast_to(w2[None], (B2, P2, H2))
    assert out2.shape == (B2, P2, H2)
    assert jnp.array_equal(out2, ref2)

    print("KERNEL_OK")
</pallas_src>

<mosaic_0001>
module attributes {stable_mosaic.version = 11 : i64} {
  func.func @_prefix_broadcast_kernel(%arg0: i32, %arg1: i32, %arg2: memref<1x256xf32, #tpu.memory_space<vmem>>, %arg3: memref<2x256xf32, #tpu.memory_space<vmem>>) attributes {dimension_semantics = [#tpu.dimension_semantics<parallel>, #tpu.dimension_semantics<parallel>], iteration_bounds = array<i64: 1, 1>, scalar_prefetch = 0 : i64, scratch_operands = 0 : i64, tpu.core_type = #tpu.core_type<tc>, window_params = [{transform_indices = @transform_0, window_bounds = array<i64: 1, 256>}, {transform_indices = @transform_1, window_bounds = array<i64: 2, 256>}]} {
    %c0 = arith.constant 0 : index
    %c0_0 = arith.constant 0 : index
    %0 = vector.load %arg2[%c0, %c0_0] : memref<1x256xf32, #tpu.memory_space<vmem>>, vector<1x256xf32>
    %1 = vector.shape_cast %0 : vector<1x256xf32> to vector<1x256xf32>
    %2 = vector.broadcast %1 : vector<1x256xf32> to vector<2x256xf32>
    %c0_1 = arith.constant 0 : index
    %c0_2 = arith.constant 0 : index
    %3 = vector.load %arg3[%c0_1, %c0_2] : memref<2x256xf32, #tpu.memory_space<vmem>>, vector<2x256xf32>
    tpu.vector_store %arg3[%c0_1, %c0_2], %2 {strides = array<i32>} : memref<2x256xf32, #tpu.memory_space<vmem>>, vector<2x256xf32>,
    return
  }
  func.func @transform_0(%arg0: i32, %arg1: i32) -> (i32, i32) {
    %c0_i32 = arith.constant 0 : i32
    %c0_i32_0 = arith.constant 0 : i32
    return %c0_i32, %arg1 : i32, i32
  }
  func.func @transform_1(%arg0: i32, %arg1: i32) -> (i32, i32) {
    %c0_i32 = arith.constant 0 : i32
    return %arg0, %arg1 : i32, i32
  }
}

</mosaic_0001>

<bundles_post_ra>
// kernel: tpu_custom_call.1
= control target key start
LH: loop header
LB: loop body
LE: loop exit
PB: predicated region body
PF: predicated region fallthrough
CT: control target
= control target key end

     0   :  { %6 = vsyncpa [#allocation3], 0  ;;  %s143_s0 = inlined_call_operand.hbm [shape: f32[1,256], index: 0, kind: input, shape index: {}]   ;;  %s144_s1 = inlined_call_operand.hbm [shape: f32[2,256], index: 1, kind: output, shape index: {}]  }
   0x1   :  { %7 = vsyncpa [#allocation4], 0  ;;  %s107_s6 = smov [#allocation2]   ;;  %s59_s10 = scalar_lea.hbm %s143_s0, 32 }
   0x2   :  { %s14_s7 = sshll.u32 %s107_s6, 4  ;;  %p60_p0 = scmp.ne.s32.totalorder %s143_s0, %s59_s10  ;;  %s15_s7 = int_to_ptr.vmem [resolvable:$true] %s14_s7 }
   0x3   :  { %p63_p1 = scmp.lt.u32.totalorder %s59_s10, %s143_s0 }
   0x5   :  { %p65_p2 = pnand %p63_p1, %p60_p0 }
   0x7   :  { %68 = shalt.err (!%p65_p2)
}
   0x8   :  { %s69_s15 = scalar_lea.vmem %s15_s7, 32  ;;  %p74_p4 = scmp.lt.s32.totalorder %s15_s7, %s15_s7 }
   0x9   :  { %p70_p3 = scmp.ne.s32.totalorder %s15_s7, %s69_s15  ;;  %p75_p5 = scmp.lt.s32.totalorder %s69_s15, %s69_s15 }
   0xb   :  { %p76_p6 = por %p75_p5, %p74_p4 }
   0xd   :  { %p77_p7 = pnand %p76_p6, %p70_p3 }
   0xf   :  { %80 = shalt.err (!%p77_p7)
}
  0x10   :  { %17 = dma.hbm_to_vmem [thread:$0]  %s143_s0, 32, %s15_s7, [#allocation3]  }
  0x11   :  { %103 = dma.done.wait [#allocation3], 32  }
  0x12   :  { %104 = vsyncadd [#allocation3], 4294967264  ;;  %v23_v0 = vlaneseq  ;;  %v21_v4 = vld [vmem:[#allocation2] sm:$0x3]  ;;  %s108_s18 = smov [#allocation5]  }
  0x13   :  { %s47_s19 = sshll.u32 %s108_s18, 4  ;;  %s48_s19 = int_to_ptr.vmem [resolvable:$true] %s47_s19 }
  0x14   :  { %v24_v1 = vshrl.u32 %v23_v0, 7  ;;  %s81_s20 = scalar_lea.vmem %s48_s19, 64  ;;  %p86_p9 = scmp.lt.s32.totalorder %s48_s19, %s48_s19 }
  0x15   :  { %p82_p8 = scmp.ne.s32.totalorder %s48_s19, %s81_s20  ;;  %p87_p10 = scmp.lt.s32.totalorder %s81_s20, %s81_s20 }
  0x16   :  { %v25_v2 = vsub.s32 0, %v24_v1  ;;  %v29_v3 = vsub.s32 1, %v24_v1 }
  0x17   :  { %p88_p11 = por %p87_p10, %p86_p9 }
  0x18   :  { %v26_v5 = vrot.slane %v21_v4, %v25_v2  ;;  %v30_v6 = vrot.slane %v21_v4, %v29_v3 }
  0x19   :  { %p89_p12 = pnand %p88_p11, %p82_p8 }
  0x1a   :  { %v31_v7 = vcombine.low %v26_v5, %v30_v6 }
  0x1c   :  { %56 = vst.sshfl [vmem:[#allocation5] sm:$0x33 pattern:$0x76325410] %v31_v7 }
  0x1d   :  { %92 = shalt.err (!%p89_p12)
}
  0x1e   :  { %s93_s22 = scalar_lea.hbm %s144_s1, 64 }
  0x1f   :  { %p94_p13 = scmp.ne.s32.totalorder %s144_s1, %s93_s22  ;;  %p97_p0 = scmp.lt.u32.totalorder %s93_s22, %s144_s1 }
  0x21   :  { %p99_p1 = pnand %p97_p0, %p94_p13 }
  0x23   :  { %102 = shalt.err (!%p99_p1)
}
  0x24   :  { %50 = dma.vmem_to_hbm [thread:$0]  %s48_s19, 64, %s144_s1, [#allocation4]  }
  0x25   :  { %105 = dma.done.wait [#allocation4], 64  }
  0x26   :  { %106 = vsyncadd [#allocation4], 4294967232 }
  0x27   :  { %54 = vsyncpa [#allocation3], 1 }
  0x28   :  { %55 = vsyncpa [#allocation4], 1 }

</bundles_post_ra>
